<compile_context>
chip_gen: v7x
topology: tpu7x:2x2x1
jax: 0.10.0
libtpu: 0.0.40
codegen_flags: <defaults>
</compile_context>

<pallas_src>
import math

import jax
import jax.numpy as jnp
from jax import lax
from jax.experimental import pallas as pl
from jax.experimental.pallas import tpu as pltpu


# ----------------------------------------------------------------------------
# helpers
# ----------------------------------------------------------------------------
def _pick_tile(n, target, mult=8):
    """Largest divisor of n that is <= target and a multiple of `mult`, else n."""
    if n <= target:
        return n
    for tcand in range(min(target, n), mult - 1, -1):
        if tcand % mult == 0 and n % tcand == 0:
            return tcand
    return n


# ----------------------------------------------------------------------------
# pass 0: GroupNorm statistics (per-channel sum / sum-of-squares over h*w)
# ----------------------------------------------------------------------------
def _gn_stats_kernel(x_ref, s1_ref, s2_ref):
    @pl.when(pl.program_id(1) == 0)
    def _init():
        s1_ref[...] = jnp.zeros_like(s1_ref)
        s2_ref[...] = jnp.zeros_like(s2_ref)

    x = x_ref[0]                                           # (T, C) f32
    s1_ref[...] += jnp.sum(x, axis=0, keepdims=True)[None]
    s2_ref[...] += jnp.sum(x * x, axis=0, keepdims=True)[None]


# ----------------------------------------------------------------------------
# pass 1: normalize + q/k/v projections (bf16 outputs, scale folded into Wq/bq)
# ----------------------------------------------------------------------------
def _norm_qkv_kernel(x_ref, sc_ref, sh_ref,
                     wq_ref, wk_ref, wv_ref, bq_ref, bk_ref, bv_ref,
                     q_ref, k_ref, v_ref):
    x = x_ref[0]                                           # (T, C) f32
    hn = (x * sc_ref[0] + sh_ref[0]).astype(jnp.bfloat16)  # GN applied as scale/shift
    # bf16 MXU operands, f32 accumulation; biases added in f32.
    # (Packing Wq|Wk|Wv into one (C,3C) matmul is possible when C % 128 == 0;
    #  kept as three dots for layout robustness at small C.)
    q = jnp.dot(hn, wq_ref[...], preferred_element_type=jnp.float32) + bq_ref[...]
    k = jnp.dot(hn, wk_ref[...], preferred_element_type=jnp.float32) + bk_ref[...]
    v = jnp.dot(hn, wv_ref[...], preferred_element_type=jnp.float32) + bv_ref[...]
    q_ref[0] = q.astype(jnp.bfloat16)                      # 1/sqrt(C) already in Wq/bq
    k_ref[0] = k.astype(jnp.bfloat16)
    v_ref[0] = v.astype(jnp.bfloat16)


# ----------------------------------------------------------------------------
# pass 2: query-tiled attention + proj_out + residual
# ----------------------------------------------------------------------------
def _attn_kernel(q_ref, k_ref, v_ref, xr_ref, wo_ref, bo_ref, o_ref):
    q = q_ref[0]                                           # (TQ, C) bf16 (pre-scaled)
    k = k_ref[0]                                           # (HW, C) bf16 (resident)
    v = v_ref[0]                                           # (HW, C) bf16 (resident)

    # scores: contract the channel (last) dim of both operands — no k.T copy.
    s = lax.dot_general(q, k, (((1,), (1,)), ((), ())),
                        preferred_element_type=jnp.float32)        # (TQ, HW) f32
    m = jnp.max(s, axis=-1, keepdims=True)
    p = jnp.exp(s - m)                                             # softmax math in f32
    denom = jnp.sum(p, axis=-1, keepdims=True)                     # (TQ, 1)

    attn = jnp.dot(p.astype(jnp.bfloat16), v,
                   preferred_element_type=jnp.float32)             # (TQ, C) f32
    attn = attn * pl.reciprocal(denom, approx=True)                # normalize after p@v

    y = jnp.dot(attn.astype(jnp.bfloat16), wo_ref[...],
                preferred_element_type=jnp.float32) + bo_ref[...]
    o_ref[0] = xr_ref[0] + y                                       # residual with ORIGINAL x


# ----------------------------------------------------------------------------
# wrapper
# ----------------------------------------------------------------------------
def memory_efficient_attn_block(x, params, *, q_tile=128, proj_tile=512):
    """x: (b, c, t, h, w).  params: see init_params."""
    b, c, t, h, w = x.shape
    hw = h * w
    bt = b * t
    g = int(params["num_groups"])
    assert c % g == 0
    gs = c // g
    eps = 1e-5
    f32, bf16 = jnp.float32, jnp.bfloat16

    # (b, c, t, h, w) -> (b*t, h*w, c): token-major, channels on the 128-lane axis.
    x_tok = jnp.transpose(x, (0, 2, 3, 4, 1)).reshape(bt, hw, c).astype(f32)

    # -------------------- pass 0: GroupNorm statistics --------------------
    ts = _pick_tile(hw, proj_tile, mult=8)
    s1, s2 = pl.pallas_call(
        _gn_stats_kernel,
        out_shape=(jax.ShapeDtypeStruct((bt, 1, c), f32),
                   jax.ShapeDtypeStruct((bt, 1, c), f32)),
        grid_spec=pltpu.PrefetchScalarGridSpec(
            num_scalar_prefetch=0,
            grid=(bt, hw // ts),
            in_specs=[pl.BlockSpec((1, ts, c), lambda i, ti: (i, ti, 0))],
            out_specs=(pl.BlockSpec((1, 1, c), lambda i, ti: (i, 0, 0)),
                       pl.BlockSpec((1, 1, c), lambda i, ti: (i, 0, 0))),
        ),
        compiler_params=pltpu.CompilerParams(
            dimension_semantics=("parallel", "arbitrary")),
    )(x_tok)

    # tiny O(bt*C) group pooling -> per-sample, per-channel scale / shift
    n_per_group = float(hw * gs)
    s1g = s1.reshape(bt, g, gs).sum(axis=2)
    s2g = s2.reshape(bt, g, gs).sum(axis=2)
    mean_g = s1g / n_per_group
    var_g = jnp.maximum(s2g / n_per_group - mean_g * mean_g, 0.0)  # clamp vs cancellation
    rstd_g = lax.rsqrt(var_g + eps)
    mean_c = jnp.repeat(mean_g, gs, axis=1)                        # (bt, C)
    rstd_c = jnp.repeat(rstd_g, gs, axis=1)
    gamma = params["gamma"].reshape(1, c).astype(f32)
    beta = params["beta"].reshape(1, c).astype(f32)
    scale_c = (gamma * rstd_c).reshape(bt, 1, c)
    shift_c = (beta - mean_c * gamma * rstd_c).reshape(bt, 1, c)

    # -------------------- pass 1: normalize + q/k/v projections --------------------
    attn_scale = 1.0 / math.sqrt(c)
    wq_t = (params["wq"].T * attn_scale).astype(bf16)   # fold softmax scale into q
    wk_t = params["wk"].T.astype(bf16)
    wv_t = params["wv"].T.astype(bf16)
    bq = (params["bq"] * attn_scale).reshape(1, c).astype(f32)
    bk = params["bk"].reshape(1, c).astype(f32)
    bv = params["bv"].reshape(1, c).astype(f32)

    tp = _pick_tile(hw, proj_tile, mult=16)             # bf16 outputs -> mult of 16

    def tok_spec(tile):
        return pl.BlockSpec((1, tile, c), lambda i, ti: (i, ti, 0))

    vec3_spec = pl.BlockSpec((1, 1, c), lambda i, ti: (i, 0, 0))
    mat_spec = pl.BlockSpec((c, c), lambda i, ti: (0, 0))
    vec_spec = pl.BlockSpec((1, c), lambda i, ti: (0, 0))

    q_all, k_all, v_all = pl.pallas_call(
        _norm_qkv_kernel,
        out_shape=tuple(jax.ShapeDtypeStruct((bt, hw, c), bf16) for _ in range(3)),
        grid_spec=pltpu.PrefetchScalarGridSpec(
            num_scalar_prefetch=0,
            grid=(bt, hw // tp),
            in_specs=[tok_spec(tp), vec3_spec, vec3_spec,
                      mat_spec, mat_spec, mat_spec,
                      vec_spec, vec_spec, vec_spec],
            out_specs=tuple(tok_spec(tp) for _ in range(3)),
        ),
        compiler_params=pltpu.CompilerParams(
            dimension_semantics=("parallel", "parallel")),
    )(x_tok, scale_c, shift_c, wq_t, wk_t, wv_t, bq, bk, bv)

    # -------------------- pass 2: attention + proj_out + residual --------------------
    tq = _pick_tile(hw, q_tile, mult=16)
    wo_t = params["wo"].T.astype(bf16)
    bo = params["bo"].reshape(1, c).astype(f32)

    # honest VMEM estimate for the chosen tiles (double-buffered K/V dominate)
    est = (2 * 2 * hw * c * 2                    # K + V blocks, 2 buffers, bf16
           + 2 * tq * c * (2 + 4 + 4)            # q(bf16) + x(f32) + out(f32) tiles, 2 buffers
           + c * c * 2 + c * 4                   # proj_out weight + bias
           + 2 * tq * hw * 4                     # score strip + exp
           + (4 << 20))                          # headroom
    vmem_limit = int(max(est, 32 << 20))

    q_spec = pl.BlockSpec((1, tq, c), lambda i, qi: (i, qi, 0))
    kv_spec = pl.BlockSpec((1, hw, c), lambda i, qi: (i, 0, 0))    # revisited across qi
    x_spec = pl.BlockSpec((1, tq, c), lambda i, qi: (i, qi, 0))
    wo_spec = pl.BlockSpec((c, c), lambda i, qi: (0, 0))
    bo_spec = pl.BlockSpec((1, c), lambda i, qi: (0, 0))

    out_tok = pl.pallas_call(
        _attn_kernel,
        out_shape=jax.ShapeDtypeStruct((bt, hw, c), f32),
        grid_spec=pltpu.PrefetchScalarGridSpec(
            num_scalar_prefetch=0,
            grid=(bt, hw // tq),
            in_specs=[q_spec, kv_spec, kv_spec, x_spec, wo_spec, bo_spec],
            out_specs=pl.BlockSpec((1, tq, c), lambda i, qi: (i, qi, 0)),
        ),
        compiler_params=pltpu.CompilerParams(
            dimension_semantics=("parallel", "parallel"),
            vmem_limit_bytes=vmem_limit),
    )(q_all, k_all, v_all, x_tok, wo_t, bo)

    # (b*t, h*w, c) -> (b, c, t, h, w)
    return out_tok.reshape(b, t, h, w, c).transpose(0, 4, 1, 2, 3).astype(x.dtype)


# ----------------------------------------------------------------------------
# references
# ----------------------------------------------------------------------------
def _reference(x, params):
    """Pure-JAX f32 reference mirroring the PyTorch module exactly."""
    b, c, t, h, w = x.shape
    hw = h * w
    x_tok = jnp.transpose(x, (0, 2, 3, 4, 1)).reshape(b * t, hw, c).astype(jnp.float32)
    g = int(params["num_groups"])
    gs = c // g
    xr = x_tok.reshape(b * t, hw, g, gs)
    mean = jnp.mean(xr, axis=(1, 3), keepdims=True)
    var = jnp.mean((xr - mean) ** 2, axis=(1, 3), keepdims=True)
    hn = ((xr - mean) / jnp.sqrt(var + 1e-5)).reshape(b * t, hw, c)
    hn = hn * params["gamma"][None, None, :] + params["beta"][None, None, :]
    q = hn @ params["wq"].T + params["bq"]
    k = hn @ params["wk"].T + params["bk"]
    v = hn @ params["wv"].T + params["bv"]
    s = jnp.einsum("bqc,bkc->bqk", q, k) / jnp.sqrt(float(c))
    p = jax.nn.softmax(s, axis=-1)
    attn = jnp.einsum("bqk,bkc->bqc", p, v)
    y = attn @ params["wo"].T + params["bo"]
    out_tok = x_tok + y
    return out_tok.reshape(b, t, h, w, c).transpose(0, 4, 1, 2, 3)


def _reference_bf16(x, params):
    """Reference that mirrors the kernel's bf16 MXU operands / f32 accumulation."""
    bf16, f32 = jnp.bfloat16, jnp.float32
    b, c, t, h, w = x.shape
    hw = h * w
    x_tok = jnp.transpose(x, (0, 2, 3, 4, 1)).reshape(b * t, hw, c).astype(f32)
    g = int(params["num_groups"])
    gs = c // g
    xr = x_tok.reshape(b * t, hw, g, gs)
    mean = jnp.mean(xr, axis=(1, 3), keepdims=True)
    var = jnp.mean((xr - mean) ** 2, axis=(1, 3), keepdims=True)
    hn = ((xr - mean) / jnp.sqrt(var + 1e-5)).reshape(b * t, hw, c)
    hn = (hn * params["gamma"][None, None, :] + params["beta"][None, None, :]).astype(bf16)
    scale = 1.0 / math.sqrt(c)

    def mm(a, w_t, bias):
        return (jnp.einsum("btc,cd->btd", a.astype(bf16), w_t.astype(bf16),
                           preferred_element_type=f32) + bias[None, None, :])

    q = mm(hn, params["wq"].T * scale, params["bq"] * scale).astype(bf16)
    k = mm(hn, params["wk"].T, params["bk"]).astype(bf16)
    v = mm(hn, params["wv"].T, params["bv"]).astype(bf16)
    s = jnp.einsum("bqc,bkc->bqk", q, k, preferred_element_type=f32)
    m = jnp.max(s, axis=-1, keepdims=True)
    p = jnp.exp(s - m)
    denom = jnp.sum(p, axis=-1, keepdims=True)
    attn = jnp.einsum("bqk,bkc->bqc", p.astype(bf16), v,
                      preferred_element_type=f32) / denom
    y = mm(attn, params["wo"].T, params["bo"])
    out_tok = x_tok + y
    return out_tok.reshape(b, t, h, w, c).transpose(0, 4, 1, 2, 3)


def init_params(key, c, num_groups=32):
    ks = jax.random.split(key, 9)
    scale = 0.1
    return {
        "num_groups": num_groups,
        "gamma": 1.0 + 0.05 * jax.random.normal(ks[0], (c,), jnp.float32),
        "beta": 0.05 * jax.random.normal(ks[1], (c,), jnp.float32),
        "wq": scale * jax.random.normal(ks[2], (c, c), jnp.float32),
        "bq": scale * jax.random.normal(ks[3], (c,), jnp.float32),
        "wk": scale * jax.random.normal(ks[4], (c, c), jnp.float32),
        "bk": scale * jax.random.normal(ks[5], (c,), jnp.float32),
        "wv": scale * jax.random.normal(ks[6], (c, c), jnp.float32),
        "bv": scale * jax.random.normal(ks[7], (c,), jnp.float32),
        "wo": scale * jax.random.normal(ks[8], (c, c), jnp.float32),
        "bo": jnp.zeros((c,), jnp.float32),
    }


if __name__ == "__main__":
    key = jax.random.PRNGKey(0)
    kx, kp = jax.random.split(key)

    # Small but representative: C = 128 (lane-dense blocks), HW = 16*16 = 256 so
    # the query tiling (TQ = 128) produces multiple grid steps per sample.
    b, c, t, h, w = 2, 128, 2, 16, 16
    x = jax.random.normal(kx, (b, c, t, h, w), jnp.float32)
    params = init_params(kp, c, num_groups=32)

    out = jax.block_until_ready(memory_efficient_attn_block(x, params))
    assert out.shape == x.shape and out.dtype == x.dtype

    # tight check vs a reference using the same bf16-operand / f32-accum matmuls
    ref_b = _reference_bf16(x, params)
    err_b = float(jnp.max(jnp.abs(out - ref_b)))
    assert jnp.allclose(out, ref_b, rtol=1e-2, atol=1e-2), (
        f"mismatch vs bf16-matched reference: max abs err {err_b}")

    # looser check vs the pure-f32 reference (covers bf16 operand rounding)
    ref_f = _reference(x, params)
    err_f = float(jnp.max(jnp.abs(out - ref_f)))
    assert jnp.allclose(out, ref_f, rtol=3e-2, atol=3e-2), (
        f"mismatch vs f32 reference: max abs err {err_f}")

    print("KERNEL_OK")
</pallas_src>

<mosaic_0001>
module attributes {stable_mosaic.version = 11 : i64} {
  func.func @_gn_stats_kernel(%arg0: i32, %arg1: i32, %arg2: memref<1x256x128xf32, #tpu.memory_space<vmem>>, %arg3: memref<1x1x128xf32, #tpu.memory_space<vmem>>, %arg4: memref<1x1x128xf32, #tpu.memory_space<vmem>>) attributes {dimension_semantics = [#tpu.dimension_semantics<parallel>, #tpu.dimension_semantics<arbitrary>], iteration_bounds = array<i64: 4, 1>, scalar_prefetch = 0 : i64, scratch_operands = 0 : i64, tpu.core_type = #tpu.core_type<tc>, window_params = [{transform_indices = @transform_0, window_bounds = array<i64: 1, 256, 128>}, {transform_indices = @transform_1, window_bounds = array<i64: 1, 1, 128>}, {transform_indices = @transform_2, window_bounds = array<i64: 1, 1, 128>}]} {
    %c0_i32 = arith.constant 0 : i32
    %0 = arith.cmpi eq, %arg1, %c0_i32 : i32
    %1 = arith.extui %0 : i1 to i32
    %c0_i32_0 = arith.constant 0 : i32
    %2 = arith.cmpi ne, %1, %c0_i32_0 : i32
    scf.if %2 {
      %cst_16 = arith.constant 0.000000e+00 : f32
      %18 = vector.broadcast %cst_16 : f32 to vector<1x1x128xf32>
      %c0_17 = arith.constant 0 : index
      %c0_18 = arith.constant 0 : index
      %c0_19 = arith.constant 0 : index
      %19 = vector.load %arg3[%c0_17, %c0_18, %c0_19] : memref<1x1x128xf32, #tpu.memory_space<vmem>>, vector<1x1x128xf32>
      tpu.vector_store %arg3[%c0_17, %c0_18, %c0_19], %18 {strides = array<i32>} : memref<1x1x128xf32, #tpu.memory_space<vmem>>, vector<1x1x128xf32>,
      %cst_20 = arith.constant 0.000000e+00 : f32
      %20 = vector.broadcast %cst_20 : f32 to vector<1x1x128xf32>
      %c0_21 = arith.constant 0 : index
      %c0_22 = arith.constant 0 : index
      %c0_23 = arith.constant 0 : index
      %21 = vector.load %arg4[%c0_21, %c0_22, %c0_23] : memref<1x1x128xf32, #tpu.memory_space<vmem>>, vector<1x1x128xf32>
      tpu.vector_store %arg4[%c0_21, %c0_22, %c0_23], %20 {strides = array<i32>} : memref<1x1x128xf32, #tpu.memory_space<vmem>>, vector<1x1x128xf32>,
    } else {
    }
    %c0 = arith.constant 0 : index
    %c0_1 = arith.constant 0 : index
    %c0_2 = arith.constant 0 : index
    %3 = vector.load %arg2[%c0, %c0_1, %c0_2] : memref<1x256x128xf32, #tpu.memory_space<vmem>>, vector<1x256x128xf32>
    %4 = vector.shape_cast %3 : vector<1x256x128xf32> to vector<256x128xf32>
    %c0_3 = arith.constant 0 : index
    %c0_4 = arith.constant 0 : index
    %c0_5 = arith.constant 0 : index
    %5 = vector.load %arg3[%c0_3, %c0_4, %c0_5] : memref<1x1x128xf32, #tpu.memory_space<vmem>>, vector<1x1x128xf32>
    %cst = arith.constant dense<0.000000e+00> : vector<128xf32>
    %6 = vector.multi_reduction <add>, %4, %cst [0] : vector<256x128xf32> to vector<128xf32>
    %7 = vector.shape_cast %6 : vector<128xf32> to vector<1x128xf32>
    %8 = vector.shape_cast %7 : vector<1x128xf32> to vector<1x1x128xf32>
    %9 = arith.addf %5, %8 : vector<1x1x128xf32>
    %c0_6 = arith.constant 0 : index
    %c0_7 = arith.constant 0 : index
    %c0_8 = arith.constant 0 : index
    %10 = vector.load %arg3[%c0_6, %c0_7, %c0_8] : memref<1x1x128xf32, #tpu.memory_space<vmem>>, vector<1x1x128xf32>
    tpu.vector_store %arg3[%c0_6, %c0_7, %c0_8], %9 {strides = array<i32>} : memref<1x1x128xf32, #tpu.memory_space<vmem>>, vector<1x1x128xf32>,
    %c0_9 = arith.constant 0 : index
    %c0_10 = arith.constant 0 : index
    %c0_11 = arith.constant 0 : index
    %11 = vector.load %arg4[%c0_9, %c0_10, %c0_11] : memref<1x1x128xf32, #tpu.memory_space<vmem>>, vector<1x1x128xf32>
    %12 = arith.mulf %4, %4 : vector<256x128xf32>
    %cst_12 = arith.constant dense<0.000000e+00> : vector<128xf32>
    %13 = vector.multi_reduction <add>, %12, %cst_12 [0] : vector<256x128xf32> to vector<128xf32>
    %14 = vector.shape_cast %13 : vector<128xf32> to vector<1x128xf32>
    %15 = vector.shape_cast %14 : vector<1x128xf32> to vector<1x1x128xf32>
    %16 = arith.addf %11, %15 : vector<1x1x128xf32>
    %c0_13 = arith.constant 0 : index
    %c0_14 = arith.constant 0 : index
    %c0_15 = arith.constant 0 : index
    %17 = vector.load %arg4[%c0_13, %c0_14, %c0_15] : memref<1x1x128xf32, #tpu.memory_space<vmem>>, vector<1x1x128xf32>
    tpu.vector_store %arg4[%c0_13, %c0_14, %c0_15], %16 {strides = array<i32>} : memref<1x1x128xf32, #tpu.memory_space<vmem>>, vector<1x1x128xf32>,
    return
  }
  func.func @transform_0(%arg0: i32, %arg1: i32) -> (i32, i32, i32) {
    %c0_i32 = arith.constant 0 : i32
    %c0_i32_0 = arith.constant 0 : i32
    return %arg0, %arg1, %c0_i32 : i32, i32, i32
  }
  func.func @transform_1(%arg0: i32, %arg1: i32) -> (i32, i32, i32) {
    %c0_i32 = arith.constant 0 : i32
    %c0_i32_0 = arith.constant 0 : i32
    %c0_i32_1 = arith.constant 0 : i32
    return %arg0, %c0_i32, %c0_i32_0 : i32, i32, i32
  }
  func.func @transform_2(%arg0: i32, %arg1: i32) -> (i32, i32, i32) {
    %c0_i32 = arith.constant 0 : i32
    %c0_i32_0 = arith.constant 0 : i32
    %c0_i32_1 = arith.constant 0 : i32
    return %arg0, %c0_i32, %c0_i32_0 : i32, i32, i32
  }
}

</mosaic_0001>

<bundles_post_ra>
// kernel: tpu_custom_call.1
= control target key start
LH: loop header
LB: loop body
LE: loop exit
PB: predicated region body
PF: predicated region fallthrough
CT: control target
= control target key end

     0   :  { %8 = vsyncpa [#allocation3], 0  ;;  %s972_s0 = inlined_call_operand.hbm [shape: f32[4,256,128], index: 0, kind: input, shape index: {}]   ;;  %s973_s1 = inlined_call_operand.hbm [shape: f32[4,1,128], index: 1, kind: output, shape index: {0}]   ;;  %s974_s2 = inlined_call_operand.hbm [shape: f32[4,1,128], index: 2, kind: output, shape index: {1}]  }
   0x1   :  { %10 = vsyncpa [#allocation3 + $0x1], 0 }
   0x2   :  { %11 = vsyncpa [#allocation4], 0 }
   0x3   :  { %13 = vsyncpa [#allocation4 + $0x1], 0 }
   0x4   :  { %14 = vsyncpa [#allocation7], 0 }
   0x5   :  { %16 = vsyncpa [#allocation7 + $0x1], 0  ;;  %s724_s9 = smov 0   ;;  %s726_s10 = smov 0  }
   0x6   :  { %s728_s11 = smov 0   ;;  %s730_s12 = smov 0  }
   0x7   :  { %s732_s13 = smov 0   ;;  %s734_s14 = smov 0  }
   0x8 LB: > { %s473_s15 = sadd.s32 4294967295, %s701_s14   ;;  %s474_s16 = sadd.s32 4294967294, %s701_s14   ;;  %s701_s14 = sphi %s734_s14, %s22_s14   ;;  %s697_s13 = sphi %s732_s13, %s988_s13   ;;  %s693_s12 = sphi %s730_s12, %s987_s12   ;;  %s689_s11 = sphi %s728_s11, %s986_s11   ;;  %s685_s10 = sphi %s726_s10, %s985_s10   ;;  %s681_s9 = sphi %s724_s9, %s984_s9  }
   0x9   : > { %s34_s17 = sadd.s32 1, %s697_s13  ;;  %s43_s18 = sadd.s32 1, %s689_s11 }
   0xa   : > { %p36_p0 = scmp.ge.s32.totalorder %s34_s17, 4  ;;  %p50_p1 = scmp.ne.s32.totalorder %s689_s11, %s685_s10 }
   0xb   : > { %p51_p2 = scmp.eq.s32.totalorder %s701_s14, 0  ;;  %p56_p3 = scmp.ne.s32.totalorder %s685_s10, %s681_s9 }
   0xc   : > { %s990_s17 = smov (%p36_p0, %s34_s17), 0  ;;  %p57_p5 = scmp.eq.s32.totalorder %s473_s15, 0 }
   0xd   : > { %p765_p4 = por %p51_p2, %p50_p1  ;;  %s38_s20 = ssub.s32 %s697_s13, %s990_s17 }
   0xe   : > { %p80_p6 = scmp.eq.s32.totalorder %s473_s15, 3  ;;  %p41_p7 = scmp.eq.s32.totalorder %s38_s20, 0 }
   0xf   : > { %p771_p8 = por %p57_p5, %p56_p3  ;;  %p86_p10 = scmp.eq.s32.totalorder %s474_s16, 3 }
  0x10   : > { %p775_p9 = por %p80_p6, %p50_p1  ;;  %p504_p12 = scmp.lt.s32.totalorder %s701_s14, 4 }
  0x11   : > { %s780_s23 = scalar_select %p41_p7, %s689_s11, %s43_s18  }
  0x12   : > { %s978_s22 = scalar_select %p775_p9, 1, 0 }
  0x13   : > { %p782_p11 = por %p86_p10, %p56_p3  ;;  %s132_s25 = sand.u32 1, %s689_s11  }
  0x14   : > { %s477_s26 = sshll.u32 %s132_s25, 8  ;;  %s486_s27 = sshll.u32 %s697_s13, 12 }
  0x15   : > { %s979_s24 = scalar_select %p782_p11, 1, 0 }
  0x16   : > { %s792_s30 = scalar_lea.hbm %s972_s0, %s486_s27  ;;  %s136_s3 = scalar_lea.vmem [#allocation2], %s477_s26 }
  0x17   : > { %s145_s4 = sshll.u32 %s136_s3, 4  ;;  %p798_p13 = pnand %p504_p12, %p765_p4  ;;  %s794_s4 = int_to_ptr.vmem [resolvable:$true] %s145_s4 }
  0x18   : > { %s803_s6 = scalar_lea.sflag [#allocation3], %s132_s25  ;;  %s557_s7 = scalar_lea.hbm %s792_s30, 4096 }
  0x19   : > { %p558_p1 = scmp.ne.s32.totalorder %s792_s30, %s557_s7  ;;  %p559_p2 = pneg %p798_p13 }
  0x1a   : > { %s562_s16 = scalar_lea.hbm %s972_s0, 16384  ;;  %p563_p4 = scmp.lt.u32.totalorder %s792_s30, %s972_s0 }
  0x1b   : > { %p560_p3 = pnand %p559_p2, %p558_p1  ;;  %p564_p6 = scmp.lt.u32.totalorder %s562_s16, %s557_s7 }
  0x1c   : > { %p566_p10 = scmp.lt.u32.totalorder %s557_s7, %s792_s30 }
  0x1d   : > { %p561_p5 = pneg %p560_p3  ;;  %p565_p7 = por %p564_p6, %p563_p4 }
  0x1f   : > { %p567_p12 = por %p566_p10, %p565_p7 }
  0x21   : > { %p568_p0 = pnand %p567_p12, %p561_p5 }
  0x23   : > { %571 = shalt.err (!%p568_p0)
}
  0x24   : > { %s572_s20 = scalar_lea.vmem %s794_s4, 4096  ;;  %s703_s25 = smov [#allocation2]  }
  0x25   : > { %p573_p1 = scmp.ne.s32.totalorder %s794_s4, %s572_s20  ;;  %s577_s26 = sshll.u32 %s703_s25, 4  ;;  %s578_s26 = int_to_ptr.vmem [resolvable:$false] %s577_s26 }
  0x26   : > { %s579_s27 = scalar_lea.vmem %s578_s26, 8192  ;;  %p580_p9 = scmp.lt.s32.totalorder %s794_s4, %s578_s26 }
  0x27   : > { %p575_p3 = pnand %p573_p1, %p559_p2  ;;  %p581_p4 = scmp.lt.s32.totalorder %s579_s27, %s572_s20 }
  0x29   : > { %p576_p11 = pneg %p575_p3  ;;  %p582_p6 = por %p581_p4, %p580_p9 }
  0x2b   : > { %p583_p7 = pnand %p582_p6, %p576_p11 }
  0x2d   : > { %586 = shalt.err (!%p583_p7)
}
  0x2e   : > { %s704_s28 = smov 128   ;;  %s705_s29 = smov 8  }
  0x2f   : > { %496 = dma.hbm_to_vmem [thread:$0]  (!%p798_p13), %s792_s30, 4096, %s794_s4, %s803_s6, %s704_s28, %s704_s28, %s705_s29  }
  0x30   : > { %p153_p0 = scmp.lt.s32.totalorder %s701_s14, 5  ;;  %p981_p2 = scmp.ge.s32.totalorder %s701_s14, 1 }
  0x32   : > { %p154_p5 = pnand %p981_p2, %p153_p0 }
  0x33   : > { %s835_s3 = sand.u32 (!%p154_p5), 1, %s685_s10  }
  0x34   : > { %157 = sbr.rel (%p154_p5) target bundleno = 174 (0xae), region = 24  ;;  %s481_s7 = sshll.u32 (!%p154_p5), %s835_s3, 8 }
  0x35   : > { %s160_s8 = scalar_lea.sflag (!%p154_p5), [#allocation3], %s835_s3  ;;  %s839_s15 = scalar_lea.vmem (!%p154_p5), [#allocation2], %s481_s7 }
  0x3b   : > { %668 = dma.done.wait (%p771_p8), %s160_s8, 4096  }
  0x3c   : > { %670 = vsyncadd (%p771_p8), %s160_s8, 4294963200  ;;  %s846_s30 = scalar_lea.vmem [#allocation5], %s835_s3  ;;  %v706_v0 = vmov 0.0   ;;  %s850_s4 = scalar_lea.vmem [#allocation6], %s835_s3  ;;  %v194_v1 = vld [vmem:[%s839_s15] sm:$0xff]  ;;  %v195_v2 = vld [vmem:[%s839_s15 + $0x8] sm:$0xff] }
  0x3d   : > { %192 = vst [vmem:[%s846_s30] sm:$0x1] %v706_v0  ;;  %193 = vst [vmem:[%s850_s4] sm:$0x1] %v706_v0  ;;  %v196_v3 = vld [vmem:[%s839_s15 + $0x10] sm:$0xff]  ;;  %v197_v4 = vld [vmem:[%s839_s15 + $0x18] sm:$0xff]  ;;  %v227_v5 = vadd.f32 %v195_v2, %v194_v1  ;;  %v267_v6 = vmul.f32 %v194_v1, %v194_v1  ;;  %v268_v7 = vmul.f32 %v195_v2, %v195_v2  ;;  %s482_s21 = sshll.u32 %s693_s12, 4  ;;  %s355_s5 = sshll.u32 %s846_s30, 4  ;;  %s895_s5 = int_to_ptr.vmem [resolvable:$true] %s355_s5 }
  0x3e   : > { %v269_v8 = vmul.f32 %v196_v3, %v196_v3  ;;  %v198_v9 = vld [vmem:[%s839_s15 + $0x20] sm:$0xff]  ;;  %v270_v11 = vmul.f32 %v197_v4, %v197_v4  ;;  %v199_v13 = vld [vmem:[%s839_s15 + $0x28] sm:$0xff]  ;;  %v200_v17 = vld [vmem:[%s839_s15 + $0x30] sm:$0xff]  ;;  %s368_s6 = sshll.u32 %s850_s4, 4  ;;  %s893_s19 = scalar_lea.hbm %s973_s1, %s482_s21  ;;  %s903_s6 = int_to_ptr.vmem [resolvable:$true] %s368_s6 }
  0x3f   : > { %v228_v10 = vadd.f32 %v227_v5, %v196_v3  ;;  %v299_v12 = vadd.f32 %v268_v7, %v267_v6  ;;  %v271_v15 = vmul.f32 %v198_v9, %v198_v9  ;;  %v272_v19 = vmul.f32 %v199_v13, %v199_v13  ;;  %v201_v21 = vld [vmem:[%s839_s15 + $0x38] sm:$0xff]  ;;  %v202_v25 = vld [vmem:[%s839_s15 + $0x40] sm:$0xff]  ;;  %v203_v29 = vld [vmem:[%s839_s15 + $0x48] sm:$0xff]  ;;  %s901_s25 = scalar_lea.hbm %s974_s2, %s482_s21  ;;  %s339_s26 = scalar_lea.sflag [#allocation4], %s835_s3 }
  0x40   : > { %v273_v23 = vmul.f32 %v200_v17, %v200_v17  ;;  %v274_v27 = vmul.f32 %v201_v21, %v201_v21  ;;  %v275_v31 = vmul.f32 %v202_v25, %v202_v25  ;;  %v204_v33 = vld [vmem:[%s839_s15 + $0x50] sm:$0xff]  ;;  %v276_v35 = vmul.f32 %v203_v29, %v203_v29  ;;  %v205_v37 = vld [vmem:[%s839_s15 + $0x58] sm:$0xff]  ;;  %v206_v41 = vld [vmem:[%s839_s15 + $0x60] sm:$0xff]  ;;  %s587_s27 = scalar_lea.vmem %s895_s5, 16  ;;  %p982_p9 = scmp.ne.s32.totalorder %s978_s22, 0 }
  0x41   : > { %v229_v14 = vadd.f32 %v228_v10, %v197_v4  ;;  %v300_v16 = vadd.f32 %v299_v12, %v269_v8  ;;  %v277_v39 = vmul.f32 %v204_v33, %v204_v33  ;;  %v278_v43 = vmul.f32 %v205_v37, %v205_v37  ;;  %v207_v45 = vld [vmem:[%s839_s15 + $0x68] sm:$0xff]  ;;  %v208_v49 = vld [vmem:[%s839_s15 + $0x70] sm:$0xff]  ;;  %v209_v53 = vld [vmem:[%s839_s15 + $0x78] sm:$0xff]  ;;  %p588_p8 = scmp.ne.s32.totalorder %s895_s5, %s587_s27  ;;  %s707_s28 = smov [#allocation5]  }
  0x42   : > { %v279_v47 = vmul.f32 %v206_v41, %v206_v41  ;;  %v280_v51 = vmul.f32 %v207_v45, %v207_v45  ;;  %v281_v55 = vmul.f32 %v208_v49, %v208_v49  ;;  %v210_v57 = vld [vmem:[%s839_s15 + $0x80] sm:$0xff]  ;;  %v282_v59 = vmul.f32 %v209_v53, %v209_v53  ;;  %v211_v61 = vld [vmem:[%s839_s15 + $0x88] sm:$0xff]  ;;  %v212_v1 = vld [vmem:[%s839_s15 + $0x90] sm:$0xff]  ;;  %s591_s29 = sshll.u32 %s707_s28, 4  ;;  %s592_s29 = int_to_ptr.vmem [resolvable:$false] %s591_s29 }
  0x43   : > { %v230_v18 = vadd.f32 %v229_v14, %v198_v9  ;;  %v301_v20 = vadd.f32 %v300_v16, %v270_v11  ;;  %v283_v63 = vmul.f32 %v210_v57, %v210_v57  ;;  %v284_v3 = vmul.f32 %v211_v61, %v211_v61  ;;  %v213_v5 = vld [vmem:[%s839_s15 + $0x98] sm:$0xff]  ;;  %v214_v9 = vld [vmem:[%s839_s15 + $0xa0] sm:$0xff]  ;;  %p589_p11 = pnand %p588_p8, %p982_p9  ;;  %s593_s7 = scalar_lea.vmem %s592_s29, 32 }
  0x44   : > { %v285_v7 = vmul.f32 %v212_v1, %v212_v1  ;;  %v286_v11 = vmul.f32 %v213_v5, %v213_v5  ;;  %p594_p10 = scmp.lt.s32.totalorder %s895_s5, %s592_s29  ;;  %p595_p12 = scmp.lt.s32.totalorder %s593_s7, %s587_s27 }
  0x45   : > { %v231_v22 = vadd.f32 %v230_v18, %v199_v13  ;;  %v302_v24 = vadd.f32 %v301_v20, %v271_v15  ;;  %v215_v13 = vld [vmem:[%s839_s15 + $0xa8] sm:$0xff]  ;;  %v287_v15 = vmul.f32 %v214_v9, %v214_v9  ;;  %p590_p13 = pneg %p589_p11 }
  0x46   : > { %p596_p1 = por %p595_p12, %p594_p10 }
  0x47   : > { %v232_v26 = vadd.f32 %v231_v22, %v200_v17  ;;  %v303_v28 = vadd.f32 %v302_v24, %v272_v19  ;;  %v216_v17 = vld [vmem:[%s839_s15 + $0xb0] sm:$0xff]  ;;  %v288_v19 = vmul.f32 %v215_v13, %v215_v13 }
  0x48   : > { %p597_p3 = pnand %p596_p1, %p590_p13 }
  0x49   : > { %v233_v30 = vadd.f32 %v232_v26, %v201_v21  ;;  %v304_v32 = vadd.f32 %v303_v28, %v273_v23  ;;  %v217_v21 = vld [vmem:[%s839_s15 + $0xb8] sm:$0xff]  ;;  %v289_v23 = vmul.f32 %v216_v17, %v216_v17 }
  0x4b   : > { %v234_v34 = vadd.f32 %v233_v30, %v202_v25  ;;  %v305_v36 = vadd.f32 %v304_v32, %v274_v27  ;;  %v218_v25 = vld [vmem:[%s839_s15 + $0xc0] sm:$0xff]  ;;  %v290_v27 = vmul.f32 %v217_v21, %v217_v21 }
  0x4d   : > { %v235_v38 = vadd.f32 %v234_v34, %v203_v29  ;;  %v306_v40 = vadd.f32 %v305_v36, %v275_v31  ;;  %v219_v29 = vld [vmem:[%s839_s15 + $0xc8] sm:$0xff]  ;;  %v291_v31 = vmul.f32 %v218_v25, %v218_v25 }
  0x4f   : > { %v236_v42 = vadd.f32 %v235_v38, %v204_v33  ;;  %v307_v44 = vadd.f32 %v306_v40, %v276_v35  ;;  %v220_v33 = vld [vmem:[%s839_s15 + $0xd0] sm:$0xff]  ;;  %v292_v35 = vmul.f32 %v219_v29, %v219_v29 }
  0x51   : > { %v237_v46 = vadd.f32 %v236_v42, %v205_v37  ;;  %v308_v48 = vadd.f32 %v307_v44, %v277_v39  ;;  %v221_v37 = vld [vmem:[%s839_s15 + $0xd8] sm:$0xff]  ;;  %v293_v39 = vmul.f32 %v220_v33, %v220_v33 }
  0x53   : > { %v238_v50 = vadd.f32 %v237_v46, %v206_v41  ;;  %v309_v52 = vadd.f32 %v308_v48, %v278_v43  ;;  %v222_v41 = vld [vmem:[%s839_s15 + $0xe0] sm:$0xff]  ;;  %v294_v43 = vmul.f32 %v221_v37, %v221_v37 }
  0x55   : > { %v239_v54 = vadd.f32 %v238_v50, %v207_v45  ;;  %v310_v56 = vadd.f32 %v309_v52, %v279_v47  ;;  %v223_v45 = vld [vmem:[%s839_s15 + $0xe8] sm:$0xff]  ;;  %v295_v47 = vmul.f32 %v222_v41, %v222_v41 }
  0x57   : > { %v240_v58 = vadd.f32 %v239_v54, %v208_v49  ;;  %v311_v60 = vadd.f32 %v310_v56, %v280_v51  ;;  %v224_v49 = vld [vmem:[%s839_s15 + $0xf0] sm:$0xff]  ;;  %v296_v51 = vmul.f32 %v223_v45, %v223_v45 }
  0x59   : > { %v241_v62 = vadd.f32 %v240_v58, %v209_v53  ;;  %v312_v0 = vadd.f32 %v311_v60, %v281_v55  ;;  %v225_v53 = vld [vmem:[%s839_s15 + $0xf8] sm:$0xff]  ;;  %v297_v55 = vmul.f32 %v224_v49, %v224_v49 }
  0x5a   : > { %v298_v58 = vmul.f32 %v225_v53, %v225_v53 }
  0x5b   : > { %v242_v2 = vadd.f32 %v241_v62, %v210_v57  ;;  %v313_v4 = vadd.f32 %v312_v0, %v282_v59 }
  0x5d   : > { %v243_v6 = vadd.f32 %v242_v2, %v211_v61  ;;  %v314_v8 = vadd.f32 %v313_v4, %v283_v63 }
  0x5f   : > { %v244_v10 = vadd.f32 %v243_v6, %v212_v1  ;;  %v315_v12 = vadd.f32 %v314_v8, %v284_v3 }
  0x61   : > { %v245_v14 = vadd.f32 %v244_v10, %v213_v5  ;;  %v316_v16 = vadd.f32 %v315_v12, %v285_v7  ;;  %v226_v7 = vld [vmem:[%s846_s30] sm:$0x1] }
  0x62   : > { %v266_v12 = vld [vmem:[%s850_s4] sm:$0x1] }
  0x63   : > { %v246_v18 = vadd.f32 %v245_v14, %v214_v9  ;;  %v317_v20 = vadd.f32 %v316_v16, %v286_v11 }
  0x65   : > { %v247_v22 = vadd.f32 %v246_v18, %v215_v13  ;;  %v318_v24 = vadd.f32 %v317_v20, %v287_v15 }
  0x67   : > { %v248_v26 = vadd.f32 %v247_v22, %v216_v17  ;;  %v319_v28 = vadd.f32 %v318_v24, %v288_v19 }
  0x69   : > { %v249_v30 = vadd.f32 %v248_v26, %v217_v21  ;;  %v320_v32 = vadd.f32 %v319_v28, %v289_v23 }
  0x6b   : > { %v250_v34 = vadd.f32 %v249_v30, %v218_v25  ;;  %v321_v36 = vadd.f32 %v320_v32, %v290_v27 }
  0x6d   : > { %v251_v38 = vadd.f32 %v250_v34, %v219_v29  ;;  %v322_v40 = vadd.f32 %v321_v36, %v291_v31 }
  0x6f   : > { %v252_v42 = vadd.f32 %v251_v38, %v220_v33  ;;  %v323_v44 = vadd.f32 %v322_v40, %v292_v35 }
  0x71   : > { %v253_v46 = vadd.f32 %v252_v42, %v221_v37  ;;  %v324_v48 = vadd.f32 %v323_v44, %v293_v39 }
  0x73   : > { %v254_v50 = vadd.f32 %v253_v46, %v222_v41  ;;  %v325_v52 = vadd.f32 %v324_v48, %v294_v43 }
  0x75   : > { %v255_v54 = vadd.f32 %v254_v50, %v223_v45  ;;  %v326_v56 = vadd.f32 %v325_v52, %v295_v47 }
  0x77   : > { %v256_v57 = vadd.f32 %v255_v54, %v224_v49  ;;  %v327_v59 = vadd.f32 %v326_v56, %v296_v51 }
  0x79   : > { %v257_v60 = vadd.f32 %v256_v57, %v225_v53  ;;  %v328_v61 = vadd.f32 %v327_v59, %v297_v55 }
  0x7b   : > { %v258_v62 = vrot.slane %v257_v60, 4  ;;  %v329_v63 = vadd.f32 %v328_v61, %v298_v58 }
  0x7d   : > { %v259_v0 = vadd.f32 %v258_v62, %v257_v60  ;;  %v330_v1 = vrot.slane %v329_v63, 4 }
  0x7f   : > { %v260_v2 = vrot.slane %v259_v0, 2  ;;  %v331_v3 = vadd.f32 %v330_v1, %v329_v63 }
  0x81   : > { %v261_v4 = vadd.f32 %v260_v2, %v259_v0  ;;  %v332_v5 = vrot.slane %v331_v3, 2 }
  0x83   : > { %v262_v6 = vrot.slane %v261_v4, 1  ;;  %v333_v8 = vadd.f32 %v332_v5, %v331_v3 }
  0x85   : > { %v263_v9 = vadd.f32 %v262_v6, %v261_v4  ;;  %v334_v10 = vrot.slane %v333_v8, 1 }
  0x87   : > { %v264_v11 = vadd.f32 %v263_v9, %v226_v7  ;;  %v335_v13 = vadd.f32 %v334_v10, %v333_v8 }
  0x89   : > { %265 = vst [vmem:[%s846_s30] sm:$0x1] %v264_v11  ;;  %v336_v14 = vadd.f32 %v335_v13, %v266_v12 }
  0x8a   : > { %600 = shalt.err (!%p597_p3)
}
  0x8b   : > { %s601_s8 = scalar_lea.hbm %s893_s19, 16  ;;  %s605_s21 = scalar_lea.hbm %s973_s1, 64 }
  0x8c   : > { %p602_p4 = scmp.ne.s32.totalorder %s893_s19, %s601_s8  ;;  %p606_p0 = scmp.lt.u32.totalorder %s893_s19, %s973_s1 }
  0x8d   : > { %p607_p2 = scmp.lt.u32.totalorder %s605_s21, %s601_s8  ;;  %p609_p8 = scmp.lt.u32.totalorder %s601_s8, %s893_s19 }
  0x8e   : > { %p603_p6 = pnand %p602_p4, %p982_p9 }
  0x8f   : > { %p608_p5 = por %p607_p2, %p606_p0 }
  0x90   : > { %p604_p7 = pneg %p603_p6 }
  0x91   : > { %p610_p11 = por %p609_p8, %p608_p5 }
  0x93   : > { %p611_p13 = pnand %p610_p11, %p604_p7 }
  0x95   : > { %614 = shalt.err (!%p611_p13)
}
  0x96   : > { %489 = dma.vmem_to_hbm [thread:$0]  (%p982_p9), %s895_s5, 16, %s893_s19, %s339_s26   ;;  %337 = vst [vmem:[%s850_s4] sm:$0x1] %v336_v14 }
  0x97   : > { %s343_s12 = scalar_lea.sflag [#allocation7], %s835_s3  ;;  %s615_s20 = scalar_lea.vmem %s903_s6, 16 }
  0x98   : > { %p616_p10 = scmp.ne.s32.totalorder %s903_s6, %s615_s20  ;;  %s708_s27 = smov [#allocation6]  }
  0x99   : > { %s619_s28 = sshll.u32 %s708_s27, 4  ;;  %s620_s28 = int_to_ptr.vmem [resolvable:$false] %s619_s28 }
  0x9a   : > { %p617_p12 = pnand %p616_p10, %p982_p9  ;;  %s621_s29 = scalar_lea.vmem %s620_s28, 32 }
  0x9b   : > { %p622_p3 = scmp.lt.s32.totalorder %s903_s6, %s620_s28  ;;  %p623_p4 = scmp.lt.s32.totalorder %s621_s29, %s615_s20 }
  0x9c   : > { %p618_p1 = pneg %p617_p12 }
  0x9d   : > { %p624_p6 = por %p623_p4, %p622_p3 }
  0x9f   : > { %p625_p7 = pnand %p624_p6, %p618_p1 }
  0xa1   : > { %628 = shalt.err (!%p625_p7)
}
  0xa2   : > { %s629_s3 = scalar_lea.hbm %s901_s25, 16  ;;  %s633_s19 = scalar_lea.hbm %s974_s2, 64 }
  0xa3   : > { %p630_p0 = scmp.ne.s32.totalorder %s901_s25, %s629_s3  ;;  %p634_p8 = scmp.lt.u32.totalorder %s901_s25, %s974_s2 }
  0xa4   : > { %p635_p11 = scmp.lt.u32.totalorder %s633_s19, %s629_s3  ;;  %p637_p10 = scmp.lt.u32.totalorder %s629_s3, %s901_s25 }
  0xa5   : > { %p631_p2 = pnand %p630_p0, %p982_p9 }
  0xa6   : > { %p636_p13 = por %p635_p11, %p634_p8 }
  0xa7   : > { %p632_p5 = pneg %p631_p2 }
  0xa8   : > { %p638_p12 = por %p637_p10, %p636_p13 }
  0xaa   : > { %p639_p1 = pnand %p638_p12, %p632_p5 }
  0xac   : > { %642 = shalt.err (!%p639_p1)
}
  0xad   : > { %490 = dma.vmem_to_hbm [thread:$0]  (%p982_p9), %s903_s6, 16, %s901_s25, %s343_s12  }
  0xae PF: > { %p505_p3 = scmp.ge.s32.totalorder %s701_s14, 2  ;;  %s380_s8 = sand.u32 1, %s681_s9  }
  0xaf   : > { %p983_p4 = scmp.ne.s32.totalorder %s979_s24, 0  ;;  %s381_s15 = scalar_lea.sflag [#allocation4], %s380_s8 }
  0xb1   : > { %p498_p6 = pnand %p505_p3, %p983_p4 }
  0xb3   : > { %672 = dma.done.wait (!%p498_p6), %s381_s15, 16  }
  0xb4   : > { %674 = vsyncadd (!%p498_p6), %s381_s15, 4294967280  ;;  %s389_s30 = scalar_lea.sflag [#allocation7], %s380_s8 }
  0xb5   : > { %676 = dma.done.wait (!%p498_p6), %s389_s30, 16  }
  0xb6   : > { %678 = vsyncadd (!%p498_p6), %s389_s30, 4294967280  ;;  %s22_s14 = sadd.s32 1, %s701_s14   ;;  %s984_s9 = smov %s685_s10 }
  0xb7   : > { %p19_p7 = scmp.ge.s32.totalorder %s22_s14, 6   ;;  %s985_s10 = smov %s689_s11 }
  0xb8   : > { %s986_s11 = smov %s780_s23  ;;  %s987_s12 = smov %s697_s13 }
  0xb9   : > { %s988_s13 = smov %s990_s17  ;;  %21 = sbr.rel (!%p19_p7) target bundleno = 8 (0x8), region = 90 }
  0xc0   :  { %393 = vsyncpa [#allocation3], 1 }
  0xc1   :  { %395 = vsyncpa [#allocation3 + $0x1], 1 }
  0xc2   :  { %396 = vsyncpa [#allocation4], 1 }
  0xc3   :  { %398 = vsyncpa [#allocation4 + $0x1], 1 }
  0xc4   :  { %399 = vsyncpa [#allocation7], 1 }
  0xc5   :  { %401 = vsyncpa [#allocation7 + $0x1], 1 }

</bundles_post_ra>
